<compile_context>
chip_gen: v6e
topology: v6e:2x2x1
jax: 0.10.0
libtpu: 0.0.40
codegen_flags: <defaults>
</compile_context>

<pallas_src>
import functools

import jax
import jax.numpy as jnp
from jax.experimental import pallas as pl
from jax.experimental.pallas import tpu as pltpu


def _round_up(x: int, m: int) -> int:
    return (x + m - 1) // m * m


def _pick_mode_block(K: int) -> int:
    """Largest of {8,4,2} dividing K while keeping >=2 mode blocks (megacore)."""
    for kb in (8, 4, 2):
        if K % kb == 0 and K // kb >= 2:
            return kb
    return 1


def _spectral_mix_kernel(w_ref, x_ref, o_ref):
    """Block-complex contraction for KB modes: out[k] = W_blk[k] @ X_blk[k].

    w_ref: (KB, 2*O_pad, 2*I_pad) bf16  -- [[wr, -wi], [wi, wr]] per mode
    x_ref: (KB, 2*I_pad, TR)      bf16  -- [xr; xi] per mode (lane-dense rows)
    o_ref: (KB, 2*O_pad, TR)      f32   -- [out_r; out_i] per mode
    """
    for k in range(w_ref.shape[0]):  # KB is small and static (<= 8)
        o_ref[k] = jnp.dot(w_ref[k], x_ref[k],
                           preferred_element_type=jnp.float32)


def _mode_mix(xk, w_r, w_i):
    """out[k, o, r] = sum_i (w_r + i*w_i)[k, o, i] * xk[k, i, r]   (complex).

    xk:   (K, I, R) complex64
    w_r:  (K, O, I) float32
    w_i:  (K, O, I) float32
    returns (K, O, R) complex64
    """
    K, I, R = xk.shape
    O = w_r.shape[1]

    I_pad = _round_up(I, 8)
    O_pad = _round_up(O, 8)
    KB = _pick_mode_block(K)

    # Row tiling: pad R only to a multiple of 128, then split into near-even
    # 128-aligned tiles.  Tile size is capped by a ~40 MiB double-buffer
    # budget so the config also fits v7x's 64 MiB VMEM.
    VMEM_BUDGET = 40 * 1024 * 1024
    per_lane_bytes = KB * (2 * I_pad * 2 + 2 * O_pad * 4)  # bf16 in + f32 out
    max_tile = (VMEM_BUDGET // (2 * per_lane_bytes)) // 128 * 128
    max_tile = max(128, min(4096, max_tile))
    R128 = _round_up(R, 128)
    n_tiles = -(-R128 // max_tile)
    TR = _round_up(-(-R128 // n_tiles), 128)
    R_pad = n_tiles * TR

    # Split complex into real/imag once (layout transpose already done by the
    # caller), pad channels/rows, and stack into the block-complex layout.
    x_r = jnp.real(xk)
    x_i = jnp.imag(xk)
    pad_x = ((0, 0), (0, I_pad - I), (0, R_pad - R))
    x_blk = jnp.concatenate(
        [jnp.pad(x_r, pad_x), jnp.pad(x_i, pad_x)], axis=1
    ).astype(jnp.bfloat16)                                # (K, 2*I_pad, R_pad)

    pad_w = ((0, 0), (0, O_pad - O), (0, I_pad - I))
    w_r_p = jnp.pad(w_r, pad_w)
    w_i_p = jnp.pad(w_i, pad_w)
    w_blk = jnp.concatenate(
        [jnp.concatenate([w_r_p, -w_i_p], axis=2),
         jnp.concatenate([w_i_p, w_r_p], axis=2)], axis=1
    ).astype(jnp.bfloat16)                                # (K, 2*O_pad, 2*I_pad)

    # Modes leading (parallel, >=2 blocks), rows innermost so the weight block
    # (index map ignores r) is revisited and not re-fetched between steps.
    grid = (K // KB, R_pad // TR)

    w_spec = pl.BlockSpec((KB, 2 * O_pad, 2 * I_pad), lambda kb, r: (kb, 0, 0))
    x_spec = pl.BlockSpec((KB, 2 * I_pad, TR), lambda kb, r: (kb, 0, r))
    o_spec = pl.BlockSpec((KB, 2 * O_pad, TR), lambda kb, r: (kb, 0, r))

    out = pl.pallas_call(
        _spectral_mix_kernel,
        out_shape=jax.ShapeDtypeStruct((K, 2 * O_pad, R_pad), jnp.float32),
        grid_spec=pltpu.PrefetchScalarGridSpec(
            num_scalar_prefetch=0,
            grid=grid,
            in_specs=[w_spec, x_spec],
            out_specs=o_spec,
        ),
        compiler_params=pltpu.CompilerParams(
            dimension_semantics=("parallel", "parallel"),
            vmem_limit_bytes=48 * 1024 * 1024,
        ),
    )(w_blk, x_blk)

    out_r = out[:, :O, :R]
    out_i = out[:, O_pad:O_pad + O, :R]
    return jax.lax.complex(out_r, out_i)


@functools.partial(jax.jit, static_argnames=("n_modes", "mode"))
def spectral_conv_factorized_prod2d(x, fourier_weight, n_modes, mode="full"):
    """Forward pass of SpectralConvFactorizedProd2d.

    x:              (B, M, N, I)            -- 'b m n i' layout (as in PyTorch)
    fourier_weight: tuple of 2 arrays (I, O, n_modes, 2)  (real/imag stacked)
    returns:        (B, M, N, O)
    """
    x = jnp.transpose(x, (0, 3, 1, 2)).astype(jnp.float32)  # (B, I, M, N)
    B, I, M, N = x.shape
    K = n_modes
    assert K <= N // 2 + 1 and K <= M // 2 + 1

    # TODO(synk): rfft/irfft have no Pallas/Mosaic primitive; FFTs run via XLA,
    # only the learned complex mode mixing runs in the Pallas kernel.
    x_fty = jnp.fft.rfft(x, axis=-1, norm="ortho")   # (B, I, M, N//2+1)
    x_ftx = jnp.fft.rfft(x, axis=-2, norm="ortho")   # (B, I, M//2+1, N)

    if mode == "full":
        w0, w1 = fourier_weight
        O = w0.shape[1]
        # Branch-1 rows r = (b, m) -> (K, I, B*M); branch-2 rows r = (b, n).
        xk1 = jnp.transpose(x_fty[..., :K], (3, 1, 0, 2)).reshape(K, I, B * M)
        xk2 = jnp.transpose(x_ftx[:, :, :K, :], (2, 1, 0, 3)).reshape(K, I, B * N)
        w0_r = jnp.transpose(w0[..., 0], (2, 1, 0))  # (K, O, I)
        w0_i = jnp.transpose(w0[..., 1], (2, 1, 0))
        w1_r = jnp.transpose(w1[..., 0], (2, 1, 0))
        w1_i = jnp.transpose(w1[..., 1], (2, 1, 0))

        if M == N:
            # Fuse both branches into one pallas_call (shared row count B*M).
            xk = jnp.concatenate([xk1, xk2], axis=0)          # (2K, I, B*M)
            w_r = jnp.concatenate([w0_r, w1_r], axis=0)
            w_i = jnp.concatenate([w0_i, w1_i], axis=0)
            out = _mode_mix(xk, w_r, w_i)                     # (2K, O, B*M)
            out1, out2 = out[:K], out[K:]
        else:
            out1 = _mode_mix(xk1, w0_r, w0_i)                 # (K, O, B*M)
            out2 = _mode_mix(xk2, w1_r, w1_i)                 # (K, O, B*N)

        out_k1 = jnp.transpose(out1.reshape(K, O, B, M), (2, 1, 3, 0))  # (B,O,M,K)
        out_k2 = jnp.transpose(out2.reshape(K, O, B, N), (2, 1, 0, 3))  # (B,O,K,N)
    elif mode == "low-pass":
        O = I
        out_k1 = x_fty[..., :K]
        out_k2 = x_ftx[:, :, :K, :]
    else:
        raise ValueError(f"unknown mode: {mode}")

    # Zero-fill the remaining modes via pad (fuses into the irfft input).
    out_fty = jnp.pad(out_k1, ((0, 0), (0, 0), (0, 0), (0, N // 2 + 1 - K)))
    xy = jnp.fft.irfft(out_fty, n=N, axis=-1, norm="ortho")   # (B, O, M, N)
    out_ftx = jnp.pad(out_k2, ((0, 0), (0, 0), (0, M // 2 + 1 - K), (0, 0)))
    xx = jnp.fft.irfft(out_ftx, n=M, axis=-2, norm="ortho")   # (B, O, M, N)

    out = xx + xy
    return jnp.transpose(out, (0, 2, 3, 1))  # (B, M, N, O)


def spectral_conv_ref(x, fourier_weight, n_modes, mode="full"):
    """Pure-JAX reference mirroring the PyTorch forward exactly (f32)."""
    x = jnp.transpose(x, (0, 3, 1, 2)).astype(jnp.float32)
    B, I, M, N = x.shape
    K = n_modes

    x_fty = jnp.fft.rfft(x, axis=-1, norm="ortho")
    if mode == "full":
        w0 = fourier_weight[0][..., 0] + 1j * fourier_weight[0][..., 1]  # (I,O,K)
        O = w0.shape[1]
        out_k = jnp.einsum("bixy,ioy->boxy", x_fty[..., :K], w0)
    else:
        O = I
        out_k = x_fty[..., :K]
    out_fty = jnp.zeros((B, O, M, N // 2 + 1), dtype=x_fty.dtype).at[..., :K].set(out_k)
    xy = jnp.fft.irfft(out_fty, n=N, axis=-1, norm="ortho")

    x_ftx = jnp.fft.rfft(x, axis=-2, norm="ortho")
    if mode == "full":
        w1 = fourier_weight[1][..., 0] + 1j * fourier_weight[1][..., 1]
        out_k = jnp.einsum("bixy,iox->boxy", x_ftx[:, :, :K, :], w1)
    else:
        out_k = x_ftx[:, :, :K, :]
    out_ftx = (
        jnp.zeros((B, O, M // 2 + 1, N), dtype=x_ftx.dtype).at[:, :, :K, :].set(out_k)
    )
    xx = jnp.fft.irfft(out_ftx, n=M, axis=-2, norm="ortho")

    return jnp.transpose(xx + xy, (0, 2, 3, 1))


if __name__ == "__main__":
    key = jax.random.PRNGKey(0)
    B, I = 2, 4
    O = I  # module writes the O-channel result into an I-channel spectrum => I == O
    n_modes = 8
    # bf16 spectra inside the kernel -> compare against the f32 reference with
    # a correspondingly loosened tolerance.
    ATOL = RTOL = 2e-2

    ok = True
    for (M, N) in [(16, 16), (16, 32)]:  # fused (M==N) and two-call paths
        k1, k2, k3, key = jax.random.split(key, 4)
        x = jax.random.normal(k1, (B, M, N, I), dtype=jnp.float32)
        w0 = 0.02 * jax.random.normal(k2, (I, O, n_modes, 2), dtype=jnp.float32)
        w1 = 0.02 * jax.random.normal(k3, (I, O, n_modes, 2), dtype=jnp.float32)
        fourier_weight = (w0, w1)

        out = spectral_conv_factorized_prod2d(x, fourier_weight, n_modes, mode="full")
        out = jax.block_until_ready(out)
        ref = spectral_conv_ref(x, fourier_weight, n_modes, mode="full")

        assert out.shape == (B, M, N, O), out.shape
        err = float(jnp.max(jnp.abs(out - ref)))
        if not jnp.allclose(out, ref, atol=ATOL, rtol=RTOL):
            ok = False
            print(f"MISMATCH at M={M}, N={N}: max abs err = {err}")

    if ok:
        print("KERNEL_OK")
</pallas_src>

<mosaic_0001>
module attributes {stable_mosaic.version = 11 : i64} {
  func.func @_spectral_mix_kernel(%arg0: i32, %arg1: i32, %arg2: memref<8x16x16xbf16, #tpu.memory_space<vmem>>, %arg3: memref<8x16x128xbf16, #tpu.memory_space<vmem>>, %arg4: memref<8x16x128xf32, #tpu.memory_space<vmem>>) attributes {dimension_semantics = [#tpu.dimension_semantics<parallel>, #tpu.dimension_semantics<parallel>], iteration_bounds = array<i64: 2, 1>, scalar_prefetch = 0 : i64, scratch_operands = 0 : i64, tpu.core_type = #tpu.core_type<tc>, window_params = [{transform_indices = @transform_0, window_bounds = array<i64: 8, 16, 16>}, {transform_indices = @transform_1, window_bounds = array<i64: 8, 16, 128>}, {transform_indices = @transform_2, window_bounds = array<i64: 8, 16, 128>}]} {
    %c0 = arith.constant 0 : index
    %c0_0 = arith.constant 0 : index
    %c0_1 = arith.constant 0 : index
    %0 = vector.load %arg2[%c0, %c0_0, %c0_1] : memref<8x16x16xbf16, #tpu.memory_space<vmem>>, vector<1x16x16xbf16>
    %1 = vector.shape_cast %0 : vector<1x16x16xbf16> to vector<16x16xbf16>
    %c0_2 = arith.constant 0 : index
    %c0_3 = arith.constant 0 : index
    %c0_4 = arith.constant 0 : index
    %2 = vector.load %arg3[%c0_2, %c0_3, %c0_4] : memref<8x16x128xbf16, #tpu.memory_space<vmem>>, vector<1x16x128xbf16>
    %3 = vector.shape_cast %2 : vector<1x16x128xbf16> to vector<16x128xbf16>
    %cst = arith.constant dense<0.000000e+00> : vector<16x128xf32>
    %4 = tpu.matmul %1, %3, %cst {dimension_numbers = #tpu.dot_dimension_numbers<[1], [0], [0], [1], [0, 0, 1, 1], [], []>} : vector<16x16xbf16>, vector<16x128xbf16>, vector<16x128xf32> -> vector<16x128xf32>
    %c0_5 = arith.constant 0 : index
    %c0_6 = arith.constant 0 : index
    %c0_7 = arith.constant 0 : index
    %5 = vector.load %arg4[%c0_5, %c0_6, %c0_7] : memref<8x16x128xf32, #tpu.memory_space<vmem>>, vector<1x16x128xf32>
    %6 = vector.shape_cast %5 : vector<1x16x128xf32> to vector<16x128xf32>
    %7 = vector.shape_cast %4 : vector<16x128xf32> to vector<1x16x128xf32>
    tpu.vector_store %arg4[%c0_5, %c0_6, %c0_7], %7 {strides = array<i32>} : memref<8x16x128xf32, #tpu.memory_space<vmem>>, vector<1x16x128xf32>,
    %c1 = arith.constant 1 : index
    %c0_8 = arith.constant 0 : index
    %c0_9 = arith.constant 0 : index
    %8 = vector.load %arg2[%c1, %c0_8, %c0_9] : memref<8x16x16xbf16, #tpu.memory_space<vmem>>, vector<1x16x16xbf16>
    %9 = vector.shape_cast %8 : vector<1x16x16xbf16> to vector<16x16xbf16>
    %c1_10 = arith.constant 1 : index
    %c0_11 = arith.constant 0 : index
    %c0_12 = arith.constant 0 : index
    %10 = vector.load %arg3[%c1_10, %c0_11, %c0_12] : memref<8x16x128xbf16, #tpu.memory_space<vmem>>, vector<1x16x128xbf16>
    %11 = vector.shape_cast %10 : vector<1x16x128xbf16> to vector<16x128xbf16>
    %cst_13 = arith.constant dense<0.000000e+00> : vector<16x128xf32>
    %12 = tpu.matmul %9, %11, %cst_13 {dimension_numbers = #tpu.dot_dimension_numbers<[1], [0], [0], [1], [0, 0, 1, 1], [], []>} : vector<16x16xbf16>, vector<16x128xbf16>, vector<16x128xf32> -> vector<16x128xf32>
    %c1_14 = arith.constant 1 : index
    %c0_15 = arith.constant 0 : index
    %c0_16 = arith.constant 0 : index
    %13 = vector.load %arg4[%c1_14, %c0_15, %c0_16] : memref<8x16x128xf32, #tpu.memory_space<vmem>>, vector<1x16x128xf32>
    %14 = vector.shape_cast %13 : vector<1x16x128xf32> to vector<16x128xf32>
    %15 = vector.shape_cast %12 : vector<16x128xf32> to vector<1x16x128xf32>
    tpu.vector_store %arg4[%c1_14, %c0_15, %c0_16], %15 {strides = array<i32>} : memref<8x16x128xf32, #tpu.memory_space<vmem>>, vector<1x16x128xf32>,
    %c2 = arith.constant 2 : index
    %c0_17 = arith.constant 0 : index
    %c0_18 = arith.constant 0 : index
    %16 = vector.load %arg2[%c2, %c0_17, %c0_18] : memref<8x16x16xbf16, #tpu.memory_space<vmem>>, vector<1x16x16xbf16>
    %17 = vector.shape_cast %16 : vector<1x16x16xbf16> to vector<16x16xbf16>
    %c2_19 = arith.constant 2 : index
    %c0_20 = arith.constant 0 : index
    %c0_21 = arith.constant 0 : index
    %18 = vector.load %arg3[%c2_19, %c0_20, %c0_21] : memref<8x16x128xbf16, #tpu.memory_space<vmem>>, vector<1x16x128xbf16>
    %19 = vector.shape_cast %18 : vector<1x16x128xbf16> to vector<16x128xbf16>
    %cst_22 = arith.constant dense<0.000000e+00> : vector<16x128xf32>
    %20 = tpu.matmul %17, %19, %cst_22 {dimension_numbers = #tpu.dot_dimension_numbers<[1], [0], [0], [1], [0, 0, 1, 1], [], []>} : vector<16x16xbf16>, vector<16x128xbf16>, vector<16x128xf32> -> vector<16x128xf32>
    %c2_23 = arith.constant 2 : index
    %c0_24 = arith.constant 0 : index
    %c0_25 = arith.constant 0 : index
    %21 = vector.load %arg4[%c2_23, %c0_24, %c0_25] : memref<8x16x128xf32, #tpu.memory_space<vmem>>, vector<1x16x128xf32>
    %22 = vector.shape_cast %21 : vector<1x16x128xf32> to vector<16x128xf32>
    %23 = vector.shape_cast %20 : vector<16x128xf32> to vector<1x16x128xf32>
    tpu.vector_store %arg4[%c2_23, %c0_24, %c0_25], %23 {strides = array<i32>} : memref<8x16x128xf32, #tpu.memory_space<vmem>>, vector<1x16x128xf32>,
    %c3 = arith.constant 3 : index
    %c0_26 = arith.constant 0 : index
    %c0_27 = arith.constant 0 : index
    %24 = vector.load %arg2[%c3, %c0_26, %c0_27] : memref<8x16x16xbf16, #tpu.memory_space<vmem>>, vector<1x16x16xbf16>
    %25 = vector.shape_cast %24 : vector<1x16x16xbf16> to vector<16x16xbf16>
    %c3_28 = arith.constant 3 : index
    %c0_29 = arith.constant 0 : index
    %c0_30 = arith.constant 0 : index
    %26 = vector.load %arg3[%c3_28, %c0_29, %c0_30] : memref<8x16x128xbf16, #tpu.memory_space<vmem>>, vector<1x16x128xbf16>
    %27 = vector.shape_cast %26 : vector<1x16x128xbf16> to vector<16x128xbf16>
    %cst_31 = arith.constant dense<0.000000e+00> : vector<16x128xf32>
    %28 = tpu.matmul %25, %27, %cst_31 {dimension_numbers = #tpu.dot_dimension_numbers<[1], [0], [0], [1], [0, 0, 1, 1], [], []>} : vector<16x16xbf16>, vector<16x128xbf16>, vector<16x128xf32> -> vector<16x128xf32>
    %c3_32 = arith.constant 3 : index
    %c0_33 = arith.constant 0 : index
    %c0_34 = arith.constant 0 : index
    %29 = vector.load %arg4[%c3_32, %c0_33, %c0_34] : memref<8x16x128xf32, #tpu.memory_space<vmem>>, vector<1x16x128xf32>
    %30 = vector.shape_cast %29 : vector<1x16x128xf32> to vector<16x128xf32>
    %31 = vector.shape_cast %28 : vector<16x128xf32> to vector<1x16x128xf32>
    tpu.vector_store %arg4[%c3_32, %c0_33, %c0_34], %31 {strides = array<i32>} : memref<8x16x128xf32, #tpu.memory_space<vmem>>, vector<1x16x128xf32>,
    %c4 = arith.constant 4 : index
    %c0_35 = arith.constant 0 : index
    %c0_36 = arith.constant 0 : index
    %32 = vector.load %arg2[%c4, %c0_35, %c0_36] : memref<8x16x16xbf16, #tpu.memory_space<vmem>>, vector<1x16x16xbf16>
    %33 = vector.shape_cast %32 : vector<1x16x16xbf16> to vector<16x16xbf16>
    %c4_37 = arith.constant 4 : index
    %c0_38 = arith.constant 0 : index
    %c0_39 = arith.constant 0 : index
    %34 = vector.load %arg3[%c4_37, %c0_38, %c0_39] : memref<8x16x128xbf16, #tpu.memory_space<vmem>>, vector<1x16x128xbf16>
    %35 = vector.shape_cast %34 : vector<1x16x128xbf16> to vector<16x128xbf16>
    %cst_40 = arith.constant dense<0.000000e+00> : vector<16x128xf32>
    %36 = tpu.matmul %33, %35, %cst_40 {dimension_numbers = #tpu.dot_dimension_numbers<[1], [0], [0], [1], [0, 0, 1, 1], [], []>} : vector<16x16xbf16>, vector<16x128xbf16>, vector<16x128xf32> -> vector<16x128xf32>
    %c4_41 = arith.constant 4 : index
    %c0_42 = arith.constant 0 : index
    %c0_43 = arith.constant 0 : index
    %37 = vector.load %arg4[%c4_41, %c0_42, %c0_43] : memref<8x16x128xf32, #tpu.memory_space<vmem>>, vector<1x16x128xf32>
    %38 = vector.shape_cast %37 : vector<1x16x128xf32> to vector<16x128xf32>
    %39 = vector.shape_cast %36 : vector<16x128xf32> to vector<1x16x128xf32>
    tpu.vector_store %arg4[%c4_41, %c0_42, %c0_43], %39 {strides = array<i32>} : memref<8x16x128xf32, #tpu.memory_space<vmem>>, vector<1x16x128xf32>,
    %c5 = arith.constant 5 : index
    %c0_44 = arith.constant 0 : index
    %c0_45 = arith.constant 0 : index
    %40 = vector.load %arg2[%c5, %c0_44, %c0_45] : memref<8x16x16xbf16, #tpu.memory_space<vmem>>, vector<1x16x16xbf16>
    %41 = vector.shape_cast %40 : vector<1x16x16xbf16> to vector<16x16xbf16>
    %c5_46 = arith.constant 5 : index
    %c0_47 = arith.constant 0 : index
    %c0_48 = arith.constant 0 : index
    %42 = vector.load %arg3[%c5_46, %c0_47, %c0_48] : memref<8x16x128xbf16, #tpu.memory_space<vmem>>, vector<1x16x128xbf16>
    %43 = vector.shape_cast %42 : vector<1x16x128xbf16> to vector<16x128xbf16>
    %cst_49 = arith.constant dense<0.000000e+00> : vector<16x128xf32>
    %44 = tpu.matmul %41, %43, %cst_49 {dimension_numbers = #tpu.dot_dimension_numbers<[1], [0], [0], [1], [0, 0, 1, 1], [], []>} : vector<16x16xbf16>, vector<16x128xbf16>, vector<16x128xf32> -> vector<16x128xf32>
    %c5_50 = arith.constant 5 : index
    %c0_51 = arith.constant 0 : index
    %c0_52 = arith.constant 0 : index
    %45 = vector.load %arg4[%c5_50, %c0_51, %c0_52] : memref<8x16x128xf32, #tpu.memory_space<vmem>>, vector<1x16x128xf32>
    %46 = vector.shape_cast %45 : vector<1x16x128xf32> to vector<16x128xf32>
    %47 = vector.shape_cast %44 : vector<16x128xf32> to vector<1x16x128xf32>
    tpu.vector_store %arg4[%c5_50, %c0_51, %c0_52], %47 {strides = array<i32>} : memref<8x16x128xf32, #tpu.memory_space<vmem>>, vector<1x16x128xf32>,
    %c6 = arith.constant 6 : index
    %c0_53 = arith.constant 0 : index
    %c0_54 = arith.constant 0 : index
    %48 = vector.load %arg2[%c6, %c0_53, %c0_54] : memref<8x16x16xbf16, #tpu.memory_space<vmem>>, vector<1x16x16xbf16>
    %49 = vector.shape_cast %48 : vector<1x16x16xbf16> to vector<16x16xbf16>
    %c6_55 = arith.constant 6 : index
    %c0_56 = arith.constant 0 : index
    %c0_57 = arith.constant 0 : index
    %50 = vector.load %arg3[%c6_55, %c0_56, %c0_57] : memref<8x16x128xbf16, #tpu.memory_space<vmem>>, vector<1x16x128xbf16>
    %51 = vector.shape_cast %50 : vector<1x16x128xbf16> to vector<16x128xbf16>
    %cst_58 = arith.constant dense<0.000000e+00> : vector<16x128xf32>
    %52 = tpu.matmul %49, %51, %cst_58 {dimension_numbers = #tpu.dot_dimension_numbers<[1], [0], [0], [1], [0, 0, 1, 1], [], []>} : vector<16x16xbf16>, vector<16x128xbf16>, vector<16x128xf32> -> vector<16x128xf32>
    %c6_59 = arith.constant 6 : index
    %c0_60 = arith.constant 0 : index
    %c0_61 = arith.constant 0 : index
    %53 = vector.load %arg4[%c6_59, %c0_60, %c0_61] : memref<8x16x128xf32, #tpu.memory_space<vmem>>, vector<1x16x128xf32>
    %54 = vector.shape_cast %53 : vector<1x16x128xf32> to vector<16x128xf32>
    %55 = vector.shape_cast %52 : vector<16x128xf32> to vector<1x16x128xf32>
    tpu.vector_store %arg4[%c6_59, %c0_60, %c0_61], %55 {strides = array<i32>} : memref<8x16x128xf32, #tpu.memory_space<vmem>>, vector<1x16x128xf32>,
    %c7 = arith.constant 7 : index
    %c0_62 = arith.constant 0 : index
    %c0_63 = arith.constant 0 : index
    %56 = vector.load %arg2[%c7, %c0_62, %c0_63] : memref<8x16x16xbf16, #tpu.memory_space<vmem>>, vector<1x16x16xbf16>
    %57 = vector.shape_cast %56 : vector<1x16x16xbf16> to vector<16x16xbf16>
    %c7_64 = arith.constant 7 : index
    %c0_65 = arith.constant 0 : index
    %c0_66 = arith.constant 0 : index
    %58 = vector.load %arg3[%c7_64, %c0_65, %c0_66] : memref<8x16x128xbf16, #tpu.memory_space<vmem>>, vector<1x16x128xbf16>
    %59 = vector.shape_cast %58 : vector<1x16x128xbf16> to vector<16x128xbf16>
    %cst_67 = arith.constant dense<0.000000e+00> : vector<16x128xf32>
    %60 = tpu.matmul %57, %59, %cst_67 {dimension_numbers = #tpu.dot_dimension_numbers<[1], [0], [0], [1], [0, 0, 1, 1], [], []>} : vector<16x16xbf16>, vector<16x128xbf16>, vector<16x128xf32> -> vector<16x128xf32>
    %c7_68 = arith.constant 7 : index
    %c0_69 = arith.constant 0 : index
    %c0_70 = arith.constant 0 : index
    %61 = vector.load %arg4[%c7_68, %c0_69, %c0_70] : memref<8x16x128xf32, #tpu.memory_space<vmem>>, vector<1x16x128xf32>
    %62 = vector.shape_cast %61 : vector<1x16x128xf32> to vector<16x128xf32>
    %63 = vector.shape_cast %60 : vector<16x128xf32> to vector<1x16x128xf32>
    tpu.vector_store %arg4[%c7_68, %c0_69, %c0_70], %63 {strides = array<i32>} : memref<8x16x128xf32, #tpu.memory_space<vmem>>, vector<1x16x128xf32>,
    return
  }
  func.func @transform_0(%arg0: i32, %arg1: i32) -> (i32, i32, i32) {
    %c0_i32 = arith.constant 0 : i32
    %c0_i32_0 = arith.constant 0 : i32
    %c0_i32_1 = arith.constant 0 : i32
    return %arg0, %c0_i32, %c0_i32_0 : i32, i32, i32
  }
  func.func @transform_1(%arg0: i32, %arg1: i32) -> (i32, i32, i32) {
    %c0_i32 = arith.constant 0 : i32
    %c0_i32_0 = arith.constant 0 : i32
    return %arg0, %c0_i32, %arg1 : i32, i32, i32
  }
  func.func @transform_2(%arg0: i32, %arg1: i32) -> (i32, i32, i32) {
    %c0_i32 = arith.constant 0 : i32
    %c0_i32_0 = arith.constant 0 : i32
    return %arg0, %c0_i32, %arg1 : i32, i32, i32
  }
}

</mosaic_0001>

<bundles_post_ra>
// kernel: reverse.6
= control target key start
LH: loop header
LB: loop body
LE: loop exit
PB: predicated region body
PF: predicated region fallthrough
CT: control target
= control target key end

     0   :  { %v2_v0 = vlaneseq  ;;  %s414_s0 = inlined_call_operand.vmem [shape: f32[2,4,16,7], index: 0, kind: input, shape index: {}]   ;;  %s415_s1 = inlined_call_operand.vmem [shape: f32[2,4,16,7], index: 1, kind: output, shape index: {}]  }
   0x1   :  { %v67_v2 = vld [vmem:[%s414_s0 + $0x10] sm:$0xff]  ;;  %v63_v3 = vld [vmem:[%s414_s0] sm:$0xff]  ;;  %v69_v4 = vld [vmem:[%s414_s0 + $0x18] sm:$0xff] }
   0x2   :  { %v3_v1 = vsub.s32 6, %v2_v0  ;;  %v65_v5 = vld [vmem:[%s414_s0 + $0x8] sm:$0xff]  ;;  %v71_v7 = vld [vmem:[%s414_s0 + $0x20] sm:$0xff]  ;;  %v77_v8 = vld [vmem:[%s414_s0 + $0x38] sm:$0xff] }
   0x3   :  { %v73_v6 = vld [vmem:[%s414_s0 + $0x28] sm:$0xff]  ;;  %v75_v9 = vld [vmem:[%s414_s0 + $0x30] sm:$0xff]  ;;  %v79_v11 = vld [vmem:[%s414_s0 + $0x40] sm:$0xff] }
   0x4   :  { %4 = vset.pattern.permute.xlu0 %v3_v1  ;;  %307 = vset.pattern.permute.xlu1 %v3_v1  ;;  %v81_v10 = vld [vmem:[%s414_s0 + $0x48] sm:$0xff]  ;;  %v85_v12 = vld [vmem:[%s414_s0 + $0x58] sm:$0xff]  ;;  %v83_v13 = vld [vmem:[%s414_s0 + $0x50] sm:$0xff] }
   0x5   :  { %111 = vperm.xlu1 %307, %v67_v2   ;;  %99 = vperm.xlu0 %4, %v63_v3   ;;  %v89_v14 = vld [vmem:[%s414_s0 + $0x68] sm:$0xff]  ;;  %v87_v15 = vld [vmem:[%s414_s0 + $0x60] sm:$0xff]  ;;  %v93_v16 = vld [vmem:[%s414_s0 + $0x78] sm:$0xff] }
   0x6   :  { %v91_v17 = vld [vmem:[%s414_s0 + $0x70] sm:$0xff] }
   0x9   :  { %117 = vperm.xlu1 %307, %v69_v4   ;;  %105 = vperm.xlu0 %4, %v65_v5  }
   0xd   :  { %129 = vperm.xlu1 %307, %v73_v6   ;;  %123 = vperm.xlu0 %4, %v71_v7  }
  0x11   :  { %141 = vperm.xlu1 %307, %v77_v8   ;;  %135 = vperm.xlu0 %4, %v75_v9  }
  0x15   :  { %153 = vperm.xlu1 %307, %v81_v10   ;;  %147 = vperm.xlu0 %4, %v79_v11  }
  0x19   :  { %165 = vperm.xlu1 %307, %v85_v12   ;;  %159 = vperm.xlu0 %4, %v83_v13  }
  0x1d   :  { %177 = vperm.xlu1 %307, %v89_v14   ;;  %171 = vperm.xlu0 %4, %v87_v15  }
  0x21   :  { %189 = vperm.xlu1 %307, %v93_v16   ;;  %183 = vperm.xlu0 %4, %v91_v17  }
  0x80   :  { %v112_v18 = vpop.permute.xlu1 %111  ;;  %v100_v19 = vpop.permute.xlu0 %99 }
  0x81   :  { %255 = vst [vmem:[%s415_s1 + $0x10] sm:$0xff] %v112_v18  ;;  %251 = vst [vmem:[%s415_s1] sm:$0xff] %v100_v19 }
  0x84   :  { %v118_v20 = vpop.permute.xlu1 %117  ;;  %v106_v21 = vpop.permute.xlu0 %105 }
  0x85   :  { %257 = vst [vmem:[%s415_s1 + $0x18] sm:$0xff] %v118_v20  ;;  %253 = vst [vmem:[%s415_s1 + $0x8] sm:$0xff] %v106_v21 }
  0x88   :  { %v130_v22 = vpop.permute.xlu1 %129  ;;  %v124_v23 = vpop.permute.xlu0 %123 }
  0x89   :  { %261 = vst [vmem:[%s415_s1 + $0x28] sm:$0xff] %v130_v22  ;;  %259 = vst [vmem:[%s415_s1 + $0x20] sm:$0xff] %v124_v23 }
  0x8c   :  { %v142_v24 = vpop.permute.xlu1 %141  ;;  %v136_v25 = vpop.permute.xlu0 %135 }
  0x8d   :  { %265 = vst [vmem:[%s415_s1 + $0x38] sm:$0xff] %v142_v24  ;;  %263 = vst [vmem:[%s415_s1 + $0x30] sm:$0xff] %v136_v25 }
  0x90   :  { %v154_v26 = vpop.permute.xlu1 %153  ;;  %v148_v27 = vpop.permute.xlu0 %147 }
  0x91   :  { %269 = vst [vmem:[%s415_s1 + $0x48] sm:$0xff] %v154_v26  ;;  %267 = vst [vmem:[%s415_s1 + $0x40] sm:$0xff] %v148_v27 }
  0x94   :  { %v166_v28 = vpop.permute.xlu1 %165  ;;  %v160_v29 = vpop.permute.xlu0 %159 }
  0x95   :  { %273 = vst [vmem:[%s415_s1 + $0x58] sm:$0xff] %v166_v28  ;;  %271 = vst [vmem:[%s415_s1 + $0x50] sm:$0xff] %v160_v29 }
  0x98   :  { %v178_v30 = vpop.permute.xlu1 %177  ;;  %v172_v31 = vpop.permute.xlu0 %171 }
  0x99   :  { %277 = vst [vmem:[%s415_s1 + $0x68] sm:$0xff] %v178_v30  ;;  %275 = vst [vmem:[%s415_s1 + $0x60] sm:$0xff] %v172_v31 }
  0x9c   :  { %v190_v32 = vpop.permute.xlu1 %189  ;;  %v184_v33 = vpop.permute.xlu0 %183 }
  0x9d   :  { %281 = vst [vmem:[%s415_s1 + $0x78] sm:$0xff] %v190_v32  ;;  %279 = vst [vmem:[%s415_s1 + $0x70] sm:$0xff] %v184_v33 }

// kernel: spectral_conv_factorized_prod2d.1
= control target key start
LH: loop header
LB: loop body
LE: loop exit
PB: predicated region body
PF: predicated region fallthrough
CT: control target
= control target key end

     0   :  { %s1050_s9 = smov 0   ;;  %s1052_s10 = smov 0   ;;  %s1144_s0 = inlined_call_operand.vmem [shape: bf16[16,16,16], index: 0, kind: input, shape index: {}]   ;;  %s1145_s1 = inlined_call_operand.vmem [shape: bf16[16,16,128], index: 1, kind: input, shape index: {}]   ;;  %s1146_s2 = inlined_call_operand.vmem [shape: f32[16,16,128], index: 2, kind: output, shape index: {}]  }
   0x1   :  { %s1054_s11 = smov 0  }
   0x2 LB: > { %s24_s12 = sadd.s32 1, %s1027_s10  ;;  %p822_p0 = scmp.ge.s32.totalorder %s1031_s11, 1  ;;  %s1031_s11 = sphi %s1054_s11, %s12_s11   ;;  %s1027_s10 = sphi %s1052_s10, %s1148_s10   ;;  %s1023_s9 = sphi %s1050_s9, %s1147_s9  }
   0x3   : > { %p26_p1 = scmp.ge.s32.totalorder %s24_s12, 2  ;;  %p145_p2 = scmp.lt.s32.totalorder %s1031_s11, 3 }
   0x5   : > { %s1150_s12 = smov (%p26_p1, %s24_s12), 0  ;;  %p146_p3 = pnand %p822_p0, %p145_p2 }
   0x6   : > { %s823_s13 = sshll.u32 (!%p146_p3), %s1023_s9, 3 }
   0x7   : > { %149 = sbr.rel (%p146_p3) target bundleno = 242 (0xf2), region = 28  ;;  %p182_p4 = scmp.lt.s32.totalorder (!%p146_p3), %s823_s13, 15 }
   0xc   : > { %v1033_v0 = vmov 0.0   ;;  %vm1034_vm0 = vmmov 0   ;;  %s1152_s13 = smov (!%p182_p4, %s823_s13), 15  ;;  %vm224_vm1 = vcmask 130048  }
   0xd   : > { %919 = vmatprep.subr.bf16.mxu0 %v1033_v0  ;;  %925 = vmatprep.subr.bf16.mxu1 %v1033_v0  ;;  %s900_s14 = sshll.u32 %s1152_s13, 3  ;;  %s902_s21 = sshll.u32 %s1152_s13, 4 }
   0xe   : > { %921 = vmatprep.mubr.msk.bf16.mxu0 %vm1034_vm0, %v1033_v0  ;;  %927 = vmatprep.mubr.msk.bf16.mxu1 %vm1034_vm0, %v1033_v0  ;;  %s1076_s17 = scalar_lea.vmem %s1144_s0, %s900_s14  ;;  %s1081_s20 = scalar_lea.vmem %s1145_s1, %s900_s14 }
   0xf   : > { %v993_v1 = vld [vmem:[%s1081_s20] sm:$0xff]   ;;  %v994_v2 = vld [vmem:[%s1081_s20 + $0x8] sm:$0xff]   ;;  %v997_v5 = vld [vmem:[%s1081_s20 + $0x10] sm:$0xff]   ;;  %s1117_s24 = scalar_lea.vmem %s1146_s2, %s902_s21 }
  0x10   : > { %920 = vmatpush3.bf16.msra.mxu0 %v993_v1  ;;  %v995_v3 = vld [vmem:[%s1076_s17] sm:$0xff]   ;;  %926 = vmatpush3.bf16.msra.mxu1 %v994_v2  ;;  %v996_v4 = vld [vmem:[%s1076_s17 + $0x8] sm:$0xff]   ;;  %v998_v6 = vld [vmem:[%s1081_s20 + $0x18] sm:$0xff]  }
  0x11   : > { %931 = vmatprep.subr.bf16.mxu0 %v1033_v0  ;;  %937 = vmatprep.subr.bf16.mxu1 %v1033_v0  ;;  %v999_v7 = vld [vmem:[%s1076_s17 + $0x10] sm:$0xff]   ;;  %v1000_v8 = vld [vmem:[%s1076_s17 + $0x18] sm:$0xff]   ;;  %v1001_v9 = vld [vmem:[%s1081_s20 + $0x20] sm:$0xff]  }
  0x12   : > { %v1002_v10 = vld [vmem:[%s1081_s20 + $0x28] sm:$0xff]   ;;  %v1003_v11 = vld [vmem:[%s1076_s17 + $0x20] sm:$0xff]   ;;  %v1005_v13 = vld [vmem:[%s1081_s20 + $0x30] sm:$0xff]  }
  0x13   : > { %922 = vmatmul.mubr.msk.bf16.vlgmr.msra.gmra.mxu0 %vm224_vm1, %v995_v3  ;;  %928 = vmatmul.mubr.msk.bf16.vlgmr.msra.gmra.mxu1 %vm224_vm1, %v996_v4  ;;  %v1004_v12 = vld [vmem:[%s1076_s17 + $0x28] sm:$0xff]   ;;  %v1006_v14 = vld [vmem:[%s1081_s20 + $0x38] sm:$0xff]   ;;  %v1007_v15 = vld [vmem:[%s1076_s17 + $0x30] sm:$0xff]  }
  0x14   : > { %932 = vmatpush3.bf16.msra.mxu0 %v997_v5  ;;  %938 = vmatpush3.bf16.msra.mxu1 %v998_v6  ;;  %v1008_v16 = vld [vmem:[%s1076_s17 + $0x38] sm:$0xff]  }
  0x15   : > { %933 = vmatprep.mubr.msk.bf16.mxu0 %vm1034_vm0, %v1033_v0  ;;  %939 = vmatprep.mubr.msk.bf16.mxu1 %vm1034_vm0, %v1033_v0 }
  0x16   : > { %943 = vmatprep.subr.bf16.mxu0 %v1033_v0  ;;  %949 = vmatprep.subr.bf16.mxu1 %v1033_v0 }
  0x1b   : > { %934 = vmatmul.mubr.msk.bf16.vlgmr.msra.gmra.mxu0 %vm224_vm1, %v999_v7  ;;  %940 = vmatmul.mubr.msk.bf16.vlgmr.msra.gmra.mxu1 %vm224_vm1, %v1000_v8 }
  0x1c   : > { %944 = vmatpush3.bf16.msra.mxu0 %v1001_v9  ;;  %950 = vmatpush3.bf16.msra.mxu1 %v1002_v10 }
  0x1d   : > { %945 = vmatprep.mubr.msk.bf16.mxu0 %vm1034_vm0, %v1033_v0  ;;  %951 = vmatprep.mubr.msk.bf16.mxu1 %vm1034_vm0, %v1033_v0 }
  0x1e   : > { %955 = vmatprep.subr.bf16.mxu0 %v1033_v0  ;;  %961 = vmatprep.subr.bf16.mxu1 %v1033_v0 }
  0x23   : > { %946 = vmatmul.mubr.msk.bf16.vlgmr.msra.gmra.mxu0 %vm224_vm1, %v1003_v11  ;;  %952 = vmatmul.mubr.msk.bf16.vlgmr.msra.gmra.mxu1 %vm224_vm1, %v1004_v12 }
  0x24   : > { %956 = vmatpush3.bf16.msra.mxu0 %v1005_v13  ;;  %962 = vmatpush3.bf16.msra.mxu1 %v1006_v14 }
  0x25   : > { %957 = vmatprep.mubr.msk.bf16.mxu0 %vm1034_vm0, %v1033_v0  ;;  %963 = vmatprep.mubr.msk.bf16.mxu1 %vm1034_vm0, %v1033_v0 }
  0x2b   : > { %958 = vmatmul.mubr.msk.bf16.vlgmr.msra.gmra.mxu0 %vm224_vm1, %v1007_v15  ;;  %964 = vmatmul.mubr.msk.bf16.vlgmr.msra.gmra.mxu1 %vm224_vm1, %v1008_v16 }
  0xd3   : > { %v262_v17 = vpop.f32.mrf.mxu0  ;;  %v325_v18 = vpop.f32.mrf.mxu1 }
  0xd4   : > { %269 = vst [vmem:[%s1117_s24] sm:$0xff] %v262_v17  ;;  %842 = vst [vmem:[%s1117_s24 + $0x10] sm:$0xff] %v325_v18 }
  0xd5   : > { %v923_v19 = vpop.f32.mrf.mxu0  ;;  %v929_v20 = vpop.f32.mrf.mxu1 }
  0xd7   : > { %v265_v21 = vpop.f32.mrf.mxu0  ;;  %v328_v22 = vpop.f32.mrf.mxu1 }
  0xd8   : > { %270 = vst [vmem:[%s1117_s24 + $0x8] sm:$0xff] %v265_v21  ;;  %843 = vst [vmem:[%s1117_s24 + $0x18] sm:$0xff] %v328_v22 }
  0xd9   : > { %v924_v23 = vpop.f32.mrf.mxu0  ;;  %v930_v24 = vpop.f32.mrf.mxu1 }
  0xdb   : > { %v389_v25 = vpop.f32.mrf.mxu0  ;;  %v453_v26 = vpop.f32.mrf.mxu1 }
  0xdc   : > { %851 = vst [vmem:[%s1117_s24 + $0x20] sm:$0xff] %v389_v25  ;;  %860 = vst [vmem:[%s1117_s24 + $0x30] sm:$0xff] %v453_v26 }
  0xdd   : > { %v935_v27 = vpop.f32.mrf.mxu0  ;;  %v941_v28 = vpop.f32.mrf.mxu1 }
  0xdf   : > { %v392_v29 = vpop.f32.mrf.mxu0  ;;  %v456_v30 = vpop.f32.mrf.mxu1 }
  0xe0   : > { %852 = vst [vmem:[%s1117_s24 + $0x28] sm:$0xff] %v392_v29  ;;  %861 = vst [vmem:[%s1117_s24 + $0x38] sm:$0xff] %v456_v30 }
  0xe1   : > { %v936_v31 = vpop.f32.mrf.mxu0  ;;  %v942_v32 = vpop.f32.mrf.mxu1 }
  0xe3   : > { %v517_v33 = vpop.f32.mrf.mxu0  ;;  %v581_v34 = vpop.f32.mrf.mxu1 }
  0xe4   : > { %869 = vst [vmem:[%s1117_s24 + $0x40] sm:$0xff] %v517_v33  ;;  %878 = vst [vmem:[%s1117_s24 + $0x50] sm:$0xff] %v581_v34 }
  0xe5   : > { %v947_v35 = vpop.f32.mrf.mxu0  ;;  %v953_v36 = vpop.f32.mrf.mxu1 }
  0xe7   : > { %v520_v37 = vpop.f32.mrf.mxu0  ;;  %v584_v38 = vpop.f32.mrf.mxu1 }
  0xe8   : > { %870 = vst [vmem:[%s1117_s24 + $0x48] sm:$0xff] %v520_v37  ;;  %879 = vst [vmem:[%s1117_s24 + $0x58] sm:$0xff] %v584_v38 }
  0xe9   : > { %v948_v39 = vpop.f32.mrf.mxu0  ;;  %v954_v40 = vpop.f32.mrf.mxu1 }
  0xeb   : > { %v645_v41 = vpop.f32.mrf.mxu0  ;;  %v709_v42 = vpop.f32.mrf.mxu1 }
  0xec   : > { %887 = vst [vmem:[%s1117_s24 + $0x60] sm:$0xff] %v645_v41  ;;  %896 = vst [vmem:[%s1117_s24 + $0x70] sm:$0xff] %v709_v42 }
  0xed   : > { %v959_v43 = vpop.f32.mrf.mxu0  ;;  %v965_v44 = vpop.f32.mrf.mxu1 }
  0xef   : > { %v648_v45 = vpop.f32.mrf.mxu0  ;;  %v712_v46 = vpop.f32.mrf.mxu1 }
  0xf0   : > { %888 = vst [vmem:[%s1117_s24 + $0x68] sm:$0xff] %v648_v45  ;;  %897 = vst [vmem:[%s1117_s24 + $0x78] sm:$0xff] %v712_v46 }
  0xf1   : > { %v960_v47 = vpop.f32.mrf.mxu0  ;;  %v966_v48 = vpop.f32.mrf.mxu1 }
  0xf2 PF: > { %s12_s11 = sadd.s32 1, %s1031_s11   ;;  %s1147_s9 = smov %s1027_s10 }
  0xf3   : > { %p9_p5 = scmp.ge.s32.totalorder %s12_s11, 4   ;;  %s1148_s10 = smov %s1150_s12 }
  0xf5   :  { %11 = sbr.rel (!%p9_p5) target bundleno = 2 (0x2), region = 82 }

</bundles_post_ra>
